<compile_context>
chip_gen: v6e
topology: v6e:2x2x1
jax: 0.10.0
libtpu: 0.0.40
codegen_flags: <defaults>
</compile_context>

<pallas_src>
import jax
import jax.numpy as jnp
from jax.experimental import pallas as pl
from jax.experimental.pallas import tpu as pltpu


def _round_up(x: int, m: int) -> int:
    return (x + m - 1) // m * m


def _vmem_budget_bytes() -> int:
    """Generation-aware scoped-VMEM budget with headroom for compiler temps."""
    try:
        cap = int(pltpu.get_tpu_info().vmem_capacity_bytes)
    except Exception:
        cap = 64 * 1024 * 1024  # conservative fallback (v7x per-TC physical)
    # ~52 MiB on 64 MiB chips (v7x), ~105 MiB on 128 MiB chips (v5e/v6e).
    return min(int(cap * 0.82), cap - 8 * 1024 * 1024)


def _make_mlp_kernel(num_relu_layers: int):
    """Fused MLP kernel: (Linear+ReLU) x num_relu_layers, Linear, softmax(dim=1)."""

    def kernel(*refs):
        x_ref = refs[0]
        out_ref = refs[-1]
        param_refs = refs[1:-1]  # alternating (W, b) pairs

        # f32 tile from HBM, cast to bf16 on the VPU (avoids a wrapper-side
        # pad/cast pass over x).
        h = x_ref[...].astype(jnp.bfloat16)  # (TB, in_pad)

        idx = 0
        # layer1 + hidden blocks: Linear + ReLU
        for _ in range(num_relu_layers):
            w = param_refs[idx][...]          # bf16 (din_pad, dout_pad), resident
            b = param_refs[idx + 1][...]      # f32  (1, dout_pad), resident
            idx += 2
            h32 = jnp.dot(h, w, preferred_element_type=jnp.float32) + b
            h32 = jnp.maximum(h32, 0.0)       # ReLU in f32 (portable to v5e)
            h = h32.astype(jnp.bfloat16)      # bf16 feed for the next MXU pass

        # out_layer: Linear (no activation); padded classes carry a -1e30 bias.
        w = param_refs[idx][...]
        b = param_refs[idx + 1][...]
        logits = jnp.dot(h, w, preferred_element_type=jnp.float32) + b

        # numerically-stable softmax over the (padded) feature axis; exact
        # normalization so rows sum to 1 before the narrow store.
        m = jnp.max(logits, axis=1, keepdims=True)
        e = jnp.exp(logits - m)               # padded classes -> exp(-huge) == 0
        denom = jnp.sum(e, axis=1, keepdims=True)
        out_ref[...] = (e / denom).astype(out_ref.dtype)

    return kernel


def _prepare_params(params):
    """Pad each layer to 128-multiples, cast W to bf16, keep biases in f32."""
    n = len(params)
    prepared = []
    for li, (w, b) in enumerate(params):
        din, dout = w.shape
        din_p, dout_p = _round_up(din, 128), _round_up(dout, 128)
        w_p = jnp.zeros((din_p, dout_p), jnp.float32).at[:din, :dout].set(w)
        if li == n - 1:
            b_p = jnp.full((1, dout_p), -1e30, jnp.float32)  # mask padded classes
        else:
            b_p = jnp.zeros((1, dout_p), jnp.float32)
        b_p = b_p.at[:, :dout].set(b.reshape(1, dout))
        prepared.append((w_p.astype(jnp.bfloat16), b_p))
    return prepared


def mlp_forward(x, params, store_dtype=jnp.bfloat16):
    """params: list of (W, b) with W as [in, out] and b as [1, out], in f32."""
    B, C = x.shape
    out_channel = params[-1][0].shape[1]
    num_relu_layers = len(params) - 1  # all but the last (W, b) pair get ReLU

    prepared = _prepare_params(params)
    in_pad = prepared[0][0].shape[0]
    out_pad = prepared[-1][0].shape[1]

    # ---- VMEM-aware batch-tile (TB) selection -------------------------------
    budget = _vmem_budget_bytes()
    # Params are single-buffered (pl.Buffered(1)) -> count them once.
    param_bytes = sum(w.size * w.dtype.itemsize + b.size * b.dtype.itemsize
                      for w, b in prepared)
    widest = max(max(w.shape[0], w.shape[1]) for w, _ in prepared)
    store_bytes = jnp.dtype(store_dtype).itemsize
    # Per-row VMEM: double-buffered f32 x tile + double-buffered out tile +
    # live f32/bf16 intermediates of the widest layer (conservative 3x f32).
    per_row = 2 * in_pad * 4 + 2 * out_pad * store_bytes + 3 * widest * 4
    avail = budget - param_bytes - 2 * 1024 * 1024
    tb_vmem = max(128, (avail // per_row) // 128 * 128) if avail > per_row * 128 else 128
    # TODO(synk): add an N-tiled weight-streaming fallback (second 'arbitrary'
    # grid axis over the widest layer's output dim) when resident params alone
    # exceed the VMEM budget (very wide hidden layers).

    if B > 128:
        # Guarantee >= 2 grid steps so "parallel" can shard the batch over
        # v7x's two TensorCores and x/out DMAs pipeline with compute.
        tb_split = _round_up(-(-B // 2), 128)
        TB = int(min(512, tb_vmem, tb_split))
    else:
        TB = 128
    B_pad = _round_up(B, TB)
    grid = (B_pad // TB,)

    # ---- input prep (skip materialization when shapes already align) --------
    if B_pad == B and in_pad == C:
        x_p = x.astype(jnp.float32)
    else:
        x_p = jnp.zeros((B_pad, in_pad), jnp.float32).at[:B, :C].set(
            x.astype(jnp.float32))

    # ---- specs ---------------------------------------------------------------
    flat_params = []
    in_specs = [pl.BlockSpec((TB, in_pad), lambda i: (i, 0))]
    for w, b in prepared:
        flat_params += [w, b]
        # Constant index maps + single buffer: params stay VMEM-resident across
        # the whole grid without a wasted second buffer.
        in_specs.append(pl.BlockSpec(w.shape, lambda i: (0, 0),
                                     pipeline_mode=pl.Buffered(buffer_count=1)))
        in_specs.append(pl.BlockSpec(b.shape, lambda i: (0, 0),
                                     pipeline_mode=pl.Buffered(buffer_count=1)))
    out_specs = pl.BlockSpec((TB, out_pad), lambda i: (i, 0))

    flops = 2 * B_pad * sum(w.shape[0] * w.shape[1] for w, _ in prepared)
    bytes_accessed = (x_p.size * x_p.dtype.itemsize + param_bytes
                      + B_pad * out_pad * store_bytes)
    cost = pl.CostEstimate(flops=flops,
                           transcendentals=B_pad * out_pad,
                           bytes_accessed=bytes_accessed)

    out_padded = pl.pallas_call(
        _make_mlp_kernel(num_relu_layers),
        out_shape=jax.ShapeDtypeStruct((B_pad, out_pad), store_dtype),
        grid=grid,
        in_specs=in_specs,
        out_specs=out_specs,
        compiler_params=pltpu.CompilerParams(
            dimension_semantics=("parallel",),
            vmem_limit_bytes=int(budget)),
        cost_estimate=cost,
    )(x_p, *flat_params)

    # Strip batch padding and the padded (masked) softmax classes; return f32.
    return out_padded[:B, :out_channel].astype(jnp.float32)


def init_mlp_params(key, in_channel, hidden_channel, out_channel, hidden_num):
    """Deterministic init mirroring the PyTorch module's parameter shapes."""
    sizes = [(in_channel, hidden_channel)]                 # layer1
    if hidden_num >= 2:
        sizes += [(hidden_channel, hidden_channel)] * (hidden_num - 1)
    sizes.append((hidden_channel, out_channel))            # out_layer

    params = []
    keys = jax.random.split(key, len(sizes))
    for k, (din, dout) in zip(keys, sizes):
        kw, kb = jax.random.split(k)
        scale = 1.0 / jnp.sqrt(jnp.float32(din))
        w = jax.random.uniform(kw, (din, dout), jnp.float32, -scale, scale)
        b = jax.random.uniform(kb, (1, dout), jnp.float32, -scale, scale)
        params.append((w, b))
    return params


def mlp_reference(x, params):
    h = x
    for w, b in params[:-1]:
        h = jnp.maximum(h @ w + b, 0.0)
    w, b = params[-1]
    logits = h @ w + b
    return jax.nn.softmax(logits, axis=1)


if __name__ == "__main__":
    in_channel, hidden_channel, out_channel, hidden_num = 16, 32, 8, 3
    batch = 8

    key = jax.random.PRNGKey(0)
    kx, kp = jax.random.split(key)
    x = jax.random.normal(kx, (batch, in_channel), jnp.float32)
    params = init_mlp_params(kp, in_channel, hidden_channel, out_channel, hidden_num)

    out = mlp_forward(x, params)
    out = jax.block_until_ready(out)

    ref = mlp_reference(x, params)
    assert out.shape == (batch, out_channel)
    # bf16 matmul operands / bf16 output store (f32 accumulation) -> loosened
    # tolerance vs the f32 reference.
    assert jnp.allclose(out, ref, atol=2e-2, rtol=2e-2), "mismatch vs reference"

    print("KERNEL_OK")
</pallas_src>

<mosaic_0001>
module attributes {stable_mosaic.version = 11 : i64} {
  func.func @kernel(%arg0: i32, %arg1: memref<128x128xf32, #tpu.memory_space<vmem>>, %arg2: memref<128x128xbf16, #tpu.memory_space<vmem>>, %arg3: memref<1x128xf32, #tpu.memory_space<vmem>>, %arg4: memref<128x128xbf16, #tpu.memory_space<vmem>>, %arg5: memref<1x128xf32, #tpu.memory_space<vmem>>, %arg6: memref<128x128xbf16, #tpu.memory_space<vmem>>, %arg7: memref<1x128xf32, #tpu.memory_space<vmem>>, %arg8: memref<128x128xbf16, #tpu.memory_space<vmem>>, %arg9: memref<1x128xf32, #tpu.memory_space<vmem>>, %arg10: memref<128x128xbf16, #tpu.memory_space<vmem>>) attributes {dimension_semantics = [#tpu.dimension_semantics<parallel>], iteration_bounds = array<i64: 1>, scalar_prefetch = 0 : i64, scratch_operands = 0 : i64, tpu.core_type = #tpu.core_type<tc>, window_params = [{transform_indices = @transform_0, window_bounds = array<i64: 128, 128>}, {pipeline_mode = #tpu.pipeline_mode<synchronous>, transform_indices = @transform_1, window_bounds = array<i64: 128, 128>}, {pipeline_mode = #tpu.pipeline_mode<synchronous>, transform_indices = @transform_2, window_bounds = array<i64: 1, 128>}, {pipeline_mode = #tpu.pipeline_mode<synchronous>, transform_indices = @transform_3, window_bounds = array<i64: 128, 128>}, {pipeline_mode = #tpu.pipeline_mode<synchronous>, transform_indices = @transform_4, window_bounds = array<i64: 1, 128>}, {pipeline_mode = #tpu.pipeline_mode<synchronous>, transform_indices = @transform_5, window_bounds = array<i64: 128, 128>}, {pipeline_mode = #tpu.pipeline_mode<synchronous>, transform_indices = @transform_6, window_bounds = array<i64: 1, 128>}, {pipeline_mode = #tpu.pipeline_mode<synchronous>, transform_indices = @transform_7, window_bounds = array<i64: 128, 128>}, {pipeline_mode = #tpu.pipeline_mode<synchronous>, transform_indices = @transform_8, window_bounds = array<i64: 1, 128>}, {transform_indices = @transform_9, window_bounds = array<i64: 128, 128>}]} {
    %c0 = arith.constant 0 : index
    %c0_0 = arith.constant 0 : index
    %0 = vector.load %arg1[%c0, %c0_0] : memref<128x128xf32, #tpu.memory_space<vmem>>, vector<128x128xf32>
    %1 = arith.truncf %0 : vector<128x128xf32> to vector<128x128xbf16>
    %c0_1 = arith.constant 0 : index
    %c0_2 = arith.constant 0 : index
    %2 = vector.load %arg2[%c0_1, %c0_2] : memref<128x128xbf16, #tpu.memory_space<vmem>>, vector<128x128xbf16>
    %c0_3 = arith.constant 0 : index
    %c0_4 = arith.constant 0 : index
    %3 = vector.load %arg3[%c0_3, %c0_4] : memref<1x128xf32, #tpu.memory_space<vmem>>, vector<1x128xf32>
    %cst = arith.constant dense<0.000000e+00> : vector<128x128xf32>
    %4 = tpu.matmul %1, %2, %cst {dimension_numbers = #tpu.dot_dimension_numbers<[1], [0], [0], [1], [0, 0, 1, 1], [], []>} : vector<128x128xbf16>, vector<128x128xbf16>, vector<128x128xf32> -> vector<128x128xf32>
    %5 = vector.broadcast %3 : vector<1x128xf32> to vector<128x128xf32>
    %6 = arith.addf %4, %5 : vector<128x128xf32>
    %cst_5 = arith.constant 0.000000e+00 : f32
    %7 = vector.broadcast %cst_5 : f32 to vector<128x128xf32>
    %8 = arith.maximumf %6, %7 : vector<128x128xf32>
    %9 = arith.truncf %8 : vector<128x128xf32> to vector<128x128xbf16>
    %c0_6 = arith.constant 0 : index
    %c0_7 = arith.constant 0 : index
    %10 = vector.load %arg4[%c0_6, %c0_7] : memref<128x128xbf16, #tpu.memory_space<vmem>>, vector<128x128xbf16>
    %c0_8 = arith.constant 0 : index
    %c0_9 = arith.constant 0 : index
    %11 = vector.load %arg5[%c0_8, %c0_9] : memref<1x128xf32, #tpu.memory_space<vmem>>, vector<1x128xf32>
    %cst_10 = arith.constant dense<0.000000e+00> : vector<128x128xf32>
    %12 = tpu.matmul %9, %10, %cst_10 {dimension_numbers = #tpu.dot_dimension_numbers<[1], [0], [0], [1], [0, 0, 1, 1], [], []>} : vector<128x128xbf16>, vector<128x128xbf16>, vector<128x128xf32> -> vector<128x128xf32>
    %13 = vector.broadcast %11 : vector<1x128xf32> to vector<128x128xf32>
    %14 = arith.addf %12, %13 : vector<128x128xf32>
    %cst_11 = arith.constant 0.000000e+00 : f32
    %15 = vector.broadcast %cst_11 : f32 to vector<128x128xf32>
    %16 = arith.maximumf %14, %15 : vector<128x128xf32>
    %17 = arith.truncf %16 : vector<128x128xf32> to vector<128x128xbf16>
    %c0_12 = arith.constant 0 : index
    %c0_13 = arith.constant 0 : index
    %18 = vector.load %arg6[%c0_12, %c0_13] : memref<128x128xbf16, #tpu.memory_space<vmem>>, vector<128x128xbf16>
    %c0_14 = arith.constant 0 : index
    %c0_15 = arith.constant 0 : index
    %19 = vector.load %arg7[%c0_14, %c0_15] : memref<1x128xf32, #tpu.memory_space<vmem>>, vector<1x128xf32>
    %cst_16 = arith.constant dense<0.000000e+00> : vector<128x128xf32>
    %20 = tpu.matmul %17, %18, %cst_16 {dimension_numbers = #tpu.dot_dimension_numbers<[1], [0], [0], [1], [0, 0, 1, 1], [], []>} : vector<128x128xbf16>, vector<128x128xbf16>, vector<128x128xf32> -> vector<128x128xf32>
    %21 = vector.broadcast %19 : vector<1x128xf32> to vector<128x128xf32>
    %22 = arith.addf %20, %21 : vector<128x128xf32>
    %cst_17 = arith.constant 0.000000e+00 : f32
    %23 = vector.broadcast %cst_17 : f32 to vector<128x128xf32>
    %24 = arith.maximumf %22, %23 : vector<128x128xf32>
    %25 = arith.truncf %24 : vector<128x128xf32> to vector<128x128xbf16>
    %c0_18 = arith.constant 0 : index
    %c0_19 = arith.constant 0 : index
    %26 = vector.load %arg8[%c0_18, %c0_19] : memref<128x128xbf16, #tpu.memory_space<vmem>>, vector<128x128xbf16>
    %c0_20 = arith.constant 0 : index
    %c0_21 = arith.constant 0 : index
    %27 = vector.load %arg9[%c0_20, %c0_21] : memref<1x128xf32, #tpu.memory_space<vmem>>, vector<1x128xf32>
    %cst_22 = arith.constant dense<0.000000e+00> : vector<128x128xf32>
    %28 = tpu.matmul %25, %26, %cst_22 {dimension_numbers = #tpu.dot_dimension_numbers<[1], [0], [0], [1], [0, 0, 1, 1], [], []>} : vector<128x128xbf16>, vector<128x128xbf16>, vector<128x128xf32> -> vector<128x128xf32>
    %29 = vector.broadcast %27 : vector<1x128xf32> to vector<128x128xf32>
    %30 = arith.addf %28, %29 : vector<128x128xf32>
    %cst_23 = arith.constant dense<0xFF800000> : vector<128xf32>
    %31 = vector.multi_reduction <maximumf>, %30, %cst_23 [1] : vector<128x128xf32> to vector<128xf32>
    %32 = vector.shape_cast %31 : vector<128xf32> to vector<128x1xf32>
    %33 = vector.broadcast %32 : vector<128x1xf32> to vector<128x128xf32>
    %34 = arith.subf %30, %33 : vector<128x128xf32>
    %35 = math.exp %34 : vector<128x128xf32>
    %cst_24 = arith.constant dense<0.000000e+00> : vector<128xf32>
    %36 = vector.multi_reduction <add>, %35, %cst_24 [1] : vector<128x128xf32> to vector<128xf32>
    %37 = vector.shape_cast %36 : vector<128xf32> to vector<128x1xf32>
    %38 = vector.broadcast %37 : vector<128x1xf32> to vector<128x128xf32>
    %39 = arith.divf %35, %38 : vector<128x128xf32>
    %40 = arith.truncf %39 : vector<128x128xf32> to vector<128x128xbf16>
    %c0_25 = arith.constant 0 : index
    %c0_26 = arith.constant 0 : index
    %41 = vector.load %arg10[%c0_25, %c0_26] : memref<128x128xbf16, #tpu.memory_space<vmem>>, vector<128x128xbf16>
    tpu.vector_store %arg10[%c0_25, %c0_26], %40 {strides = array<i32>} : memref<128x128xbf16, #tpu.memory_space<vmem>>, vector<128x128xbf16>,
    return
  }
  func.func @transform_0(%arg0: i32) -> (i32, i32) {
    %c0_i32 = arith.constant 0 : i32
    %c0_i32_0 = arith.constant 0 : i32
    return %arg0, %c0_i32 : i32, i32
  }
  func.func @transform_1(%arg0: i32) -> (i32, i32) {
    %c0_i32 = arith.constant 0 : i32
    %c0_i32_0 = arith.constant 0 : i32
    %c0_i32_1 = arith.constant 0 : i32
    return %c0_i32, %c0_i32_0 : i32, i32
  }
  func.func @transform_2(%arg0: i32) -> (i32, i32) {
    %c0_i32 = arith.constant 0 : i32
    %c0_i32_0 = arith.constant 0 : i32
    %c0_i32_1 = arith.constant 0 : i32
    return %c0_i32, %c0_i32_0 : i32, i32
  }
  func.func @transform_3(%arg0: i32) -> (i32, i32) {
    %c0_i32 = arith.constant 0 : i32
    %c0_i32_0 = arith.constant 0 : i32
    %c0_i32_1 = arith.constant 0 : i32
    return %c0_i32, %c0_i32_0 : i32, i32
  }
  func.func @transform_4(%arg0: i32) -> (i32, i32) {
    %c0_i32 = arith.constant 0 : i32
    %c0_i32_0 = arith.constant 0 : i32
    %c0_i32_1 = arith.constant 0 : i32
    return %c0_i32, %c0_i32_0 : i32, i32
  }
  func.func @transform_5(%arg0: i32) -> (i32, i32) {
    %c0_i32 = arith.constant 0 : i32
    %c0_i32_0 = arith.constant 0 : i32
    %c0_i32_1 = arith.constant 0 : i32
    return %c0_i32, %c0_i32_0 : i32, i32
  }
  func.func @transform_6(%arg0: i32) -> (i32, i32) {
    %c0_i32 = arith.constant 0 : i32
    %c0_i32_0 = arith.constant 0 : i32
    %c0_i32_1 = arith.constant 0 : i32
    return %c0_i32, %c0_i32_0 : i32, i32
  }
  func.func @transform_7(%arg0: i32) -> (i32, i32) {
    %c0_i32 = arith.constant 0 : i32
    %c0_i32_0 = arith.constant 0 : i32
    %c0_i32_1 = arith.constant 0 : i32
    return %c0_i32, %c0_i32_0 : i32, i32
  }
  func.func @transform_8(%arg0: i32) -> (i32, i32) {
    %c0_i32 = arith.constant 0 : i32
    %c0_i32_0 = arith.constant 0 : i32
    %c0_i32_1 = arith.constant 0 : i32
    return %c0_i32, %c0_i32_0 : i32, i32
  }
  func.func @transform_9(%arg0: i32) -> (i32, i32) {
    %c0_i32 = arith.constant 0 : i32
    %c0_i32_0 = arith.constant 0 : i32
    return %arg0, %c0_i32 : i32, i32
  }
}

</mosaic_0001>

<bundles_post_ra>
// kernel: tpu_custom_call.1
= control target key start
LH: loop header
LB: loop body
LE: loop exit
PB: predicated region body
PF: predicated region fallthrough
CT: control target
= control target key end

     0   :  { %14 = vsyncpa [#allocation3], 0  ;;  %s1851_s0 = inlined_call_operand.hbm [shape: f32[128,128], index: 0, kind: input, shape index: {}]   ;;  %s1852_s1 = inlined_call_operand.hbm [shape: bf16[128,128], index: 1, kind: input, shape index: {}]   ;;  %s1853_s2 = inlined_call_operand.vmem [shape: f32[1,128], index: 2, kind: input, shape index: {}]   ;;  %s1854_s3 = inlined_call_operand.hbm [shape: bf16[128,128], index: 3, kind: input, shape index: {}]   ;;  %s1855_s4 = inlined_call_operand.vmem [shape: f32[1,128], index: 4, kind: input, shape index: {}]   ;;  %s1856_s5 = inlined_call_operand.hbm [shape: bf16[128,128], index: 5, kind: input, shape index: {}]   ;;  %s1857_s6 = inlined_call_operand.vmem [shape: f32[1,128], index: 6, kind: input, shape index: {}]   ;;  %s1858_s7 = inlined_call_operand.hbm [shape: bf16[128,128], index: 7, kind: input, shape index: {}]   ;;  %s1859_s8 = inlined_call_operand.vmem [shape: f32[1,128], index: 8, kind: input, shape index: {}]   ;;  %s1860_s9 = inlined_call_operand.hbm [shape: bf16[128,128], index: 9, kind: output, shape index: {}]  }
   0x1   :  { %15 = vsyncpa [#allocation6], 0 }
   0x2   :  { %16 = vsyncpa [#allocation9], 0 }
   0x3   :  { %17 = vsyncpa [#allocation4], 0  ;;  %s1654_s30 = smov [#allocation5]  }
   0x4   :  { %s35_s10 = sshll.u32 %s1654_s30, 4  ;;  %s36_s10 = int_to_ptr.vmem [resolvable:$true] %s35_s10 }
   0x5   :  { %s1534_s11 = scalar_lea.vmem %s36_s10, 1024  ;;  %p1539_p1 = scmp.lt.s32.totalorder %s36_s10, %s36_s10 }
   0x6   :  { %p1535_p0 = scmp.ne.s32.totalorder %s36_s10, %s1534_s11  ;;  %p1540_p2 = scmp.lt.s32.totalorder %s1534_s11, %s1534_s11 }
   0x8   :  { %p1541_p3 = por %p1540_p2, %p1539_p1 }
   0xa   :  { %p1542_p4 = pnand %p1541_p3, %p1535_p0 }
   0xc   :  { %1545 = shalt.err (!%p1542_p4)
}
   0xd   :  { %s1655_s12 = smov 64   ;;  %s1656_s13 = smov 4  }
   0xe   :  { %41 = dma.hbm_to_vmem [thread:$0]  %s1852_s1, 1024, %s36_s10, [#allocation6], %s1655_s12, %s1655_s12, %s1656_s13  }
   0xf   :  { %s1657_s16 = smov [#allocation8]   ;;  %s1658_s18 = smov [#allocation2]  }
  0x10   :  { %s63_s17 = sshll.u32 %s1657_s16, 4  ;;  %s23_s19 = sshll.u32 %s1658_s18, 4  ;;  %s64_s17 = int_to_ptr.vmem [resolvable:$true] %s63_s17  ;;  %s24_s19 = int_to_ptr.vmem [resolvable:$true] %s23_s19 }
  0x11   :  { %s1554_s20 = scalar_lea.vmem %s64_s17, 1024  ;;  %p1559_p6 = scmp.lt.s32.totalorder %s64_s17, %s64_s17 }
  0x12   :  { %p1555_p5 = scmp.ne.s32.totalorder %s64_s17, %s1554_s20  ;;  %p1560_p7 = scmp.lt.s32.totalorder %s1554_s20, %s1554_s20 }
  0x14   :  { %p1561_p8 = por %p1560_p7, %p1559_p6 }
  0x16   :  { %p1562_p9 = pnand %p1561_p8, %p1555_p5 }
  0x18   :  { %1565 = shalt.err (!%p1562_p9)
}
  0x19   :  { %69 = dma.hbm_to_vmem [thread:$0]  %s1856_s5, 1024, %s64_s17, [#allocation9], %s1655_s12, %s1655_s12, %s1656_s13  }
  0x1a   :  { %s1574_s1 = scalar_lea.vmem %s24_s19, 2048  ;;  %p1579_p11 = scmp.lt.s32.totalorder %s24_s19, %s24_s19 }
  0x1b   :  { %p1575_p10 = scmp.ne.s32.totalorder %s24_s19, %s1574_s1  ;;  %p1580_p12 = scmp.lt.s32.totalorder %s1574_s1, %s1574_s1 }
  0x1d   :  { %p1581_p13 = por %p1580_p12, %p1579_p11 }
  0x1f   :  { %p1582_p0 = pnand %p1581_p13, %p1575_p10 }
  0x21   :  { %1585 = shalt.err (!%p1582_p0)
}
  0x22   :  { %s1659_s23 = smov 128   ;;  %s1660_s24 = smov 8  }
  0x23   :  { %29 = dma.hbm_to_vmem [thread:$0]  %s1851_s0, 2048, %s24_s19, [#allocation3], %s1659_s23, %s1659_s23, %s1660_s24  }
  0x24   :  { %s1661_s27 = smov [#allocation7]   ;;  %s1662_s29 = smov [#allocation10]  }
  0x25   :  { %s49_s28 = sshll.u32 %s1661_s27, 4  ;;  %s77_s30 = sshll.u32 %s1662_s29, 4  ;;  %s50_s28 = int_to_ptr.vmem [resolvable:$true] %s49_s28  ;;  %s78_s30 = int_to_ptr.vmem [resolvable:$true] %s77_s30 }
  0x26   :  { %s1594_s5 = scalar_lea.vmem %s50_s28, 1024  ;;  %p1599_p2 = scmp.lt.s32.totalorder %s50_s28, %s50_s28 }
  0x27   :  { %p1595_p1 = scmp.ne.s32.totalorder %s50_s28, %s1594_s5  ;;  %p1600_p3 = scmp.lt.s32.totalorder %s1594_s5, %s1594_s5 }
  0x29   :  { %p1601_p4 = por %p1600_p3, %p1599_p2 }
  0x2b   :  { %p1602_p5 = pnand %p1601_p4, %p1595_p1 }
  0x2d   :  { %1605 = shalt.err (!%p1602_p5)
}
  0x2e   :  { %55 = dma.hbm_to_vmem [thread:$0]  %s1854_s3, 1024, %s50_s28, [#allocation6], %s1655_s12, %s1655_s12, %s1656_s13  }
  0x2f   :  { %s1614_s0 = scalar_lea.vmem %s78_s30, 1024  ;;  %p1619_p7 = scmp.lt.s32.totalorder %s78_s30, %s78_s30 }
  0x30   :  { %p1615_p6 = scmp.ne.s32.totalorder %s78_s30, %s1614_s0  ;;  %p1620_p8 = scmp.lt.s32.totalorder %s1614_s0, %s1614_s0 }
  0x32   :  { %p1621_p9 = por %p1620_p8, %p1619_p7 }
  0x34   :  { %p1622_p10 = pnand %p1621_p9, %p1615_p6 }
  0x36   :  { %1625 = shalt.err (!%p1622_p10)
}
  0x37   :  { %83 = dma.hbm_to_vmem [thread:$0]  %s1858_s7, 1024, %s78_s30, [#allocation9], %s1655_s12, %s1655_s12, %s1656_s13  }
  0x38   :  { %1646 = dma.done.wait [#allocation3], 2048  }
  0x39   :  { %1647 = vsyncadd [#allocation3], 4294965248 }
  0x3a   :  { %1648 = dma.done.wait [#allocation6], 2048  }
  0x3b   :  { %1649 = vsyncadd [#allocation6], 4294965248 }
  0x3c   :  { %1650 = dma.done.wait [#allocation9], 2048  }
  0x3d   :  { %1651 = vsyncadd [#allocation9], 4294965248  ;;  %v1430_v0 = vld [vmem:[#allocation5 + $0x38] sm:$0xff]   ;;  %v1431_v1 = vld [vmem:[#allocation5 + $0x30] sm:$0xff]  }
  0x3e   :  { %1292 = vmatprep.subr.bf16.mxu0 %v1430_v0  ;;  %v1432_v2 = vld [vmem:[#allocation5 + $0x28] sm:$0xff]   ;;  %v1433_v3 = vld [vmem:[#allocation5 + $0x20] sm:$0xff]   ;;  %v1434_v7 = vld [vmem:[#allocation5 + $0x18] sm:$0xff]  }
  0x3f   :  { %1293 = vmatpush3.bf16.msra.mxu0 %v1430_v0  ;;  %v102_v4 = vld [vmem:[#allocation2] sm:$0xff]  ;;  %v103_v5 = vld [vmem:[#allocation2 + $0x8] sm:$0xff]  ;;  %v1438_v8 = vld [vmem:[#allocation7 + $0x38] sm:$0xff]  }
  0x40   :  { %1294 = vmatprep.subr.bf16.mxu0 %v1431_v1  ;;  %v118_v6 = vpack.c.bf16 %v103_v5, %v102_v4  ;;  %v1439_v9 = vld [vmem:[#allocation7 + $0x30] sm:$0xff]   ;;  %1324 = vmatprep.subr.bf16.mxu1 %v1438_v8  ;;  %v1436_v11 = vld [vmem:[#allocation5 + $0x8] sm:$0xff]   ;;  %v1441_v13 = vld [vmem:[#allocation7 + $0x20] sm:$0xff]  }
  0x41   :  { %v1435_v10 = vld [vmem:[#allocation5 + $0x10] sm:$0xff]   ;;  %1325 = vmatpush3.bf16.msra.mxu1 %v1438_v8  ;;  %v1440_v12 = vld [vmem:[#allocation7 + $0x28] sm:$0xff]   ;;  %v1437_v14 = vld [vmem:[#allocation5] sm:$0xff]  }
  0x42   :  { %1308 = vmatprep.mubr.bf16.mxu0 %v118_v6  ;;  %1326 = vmatprep.subr.bf16.mxu1 %v1439_v9  ;;  %v1442_v15 = vld [vmem:[#allocation7 + $0x18] sm:$0xff]   ;;  %v104_v16 = vld [vmem:[#allocation2 + $0x10] sm:$0xff]  ;;  %v106_v18 = vld [vmem:[#allocation2 + $0x20] sm:$0xff] }
  0x43   :  { %1295 = vmatpush3.bf16.msra.mxu0 %v1431_v1  ;;  %v105_v17 = vld [vmem:[#allocation2 + $0x18] sm:$0xff]  ;;  %v107_v19 = vld [vmem:[#allocation2 + $0x28] sm:$0xff]  ;;  %v108_v22 = vld [vmem:[#allocation2 + $0x30] sm:$0xff] }
  0x44   :  { %1296 = vmatprep.subr.bf16.mxu0 %v1432_v2  ;;  %v119_v20 = vpack.c.bf16 %v105_v17, %v104_v16  ;;  %v120_v21 = vpack.c.bf16 %v107_v19, %v106_v18  ;;  %v109_v23 = vld [vmem:[#allocation2 + $0x38] sm:$0xff]  ;;  %v110_v24 = vld [vmem:[#allocation2 + $0x40] sm:$0xff]  ;;  %v111_v25 = vld [vmem:[#allocation2 + $0x48] sm:$0xff] }
  0x45   :  { %1327 = vmatpush3.bf16.msra.mxu1 %v1439_v9  ;;  %v121_v26 = vpack.c.bf16 %v109_v23, %v108_v22  ;;  %v122_v27 = vpack.c.bf16 %v111_v25, %v110_v24  ;;  %v112_v28 = vld [vmem:[#allocation2 + $0x50] sm:$0xff]  ;;  %v113_v29 = vld [vmem:[#allocation2 + $0x58] sm:$0xff]  ;;  %v114_v30 = vld [vmem:[#allocation2 + $0x60] sm:$0xff] }
  0x46   :  { %1328 = vmatprep.subr.bf16.mxu1 %v1440_v12  ;;  %v115_v31 = vld [vmem:[#allocation2 + $0x68] sm:$0xff]  ;;  %v123_v32 = vpack.c.bf16 %v113_v29, %v112_v28  ;;  %v116_v34 = vld [vmem:[#allocation2 + $0x70] sm:$0xff]  ;;  %v117_v35 = vld [vmem:[#allocation2 + $0x78] sm:$0xff] }
  0x47   :  { %1297 = vmatpush3.bf16.msra.mxu0 %v1432_v2  ;;  %v124_v33 = vpack.c.bf16 %v115_v31, %v114_v30  ;;  %v125_v36 = vpack.c.bf16 %v117_v35, %v116_v34  ;;  %v1443_v37 = vld [vmem:[#allocation7 + $0x10] sm:$0xff]   ;;  %v1444_v38 = vld [vmem:[#allocation7 + $0x8] sm:$0xff]   ;;  %v1445_v39 = vld [vmem:[#allocation7] sm:$0xff]  }
  0x48   :  { %1298 = vmatprep.subr.bf16.mxu0 %v1433_v3  ;;  %v1446_v40 = vld [vmem:[#allocation8 + $0x38] sm:$0xff]   ;;  %v1447_v41 = vld [vmem:[#allocation8 + $0x30] sm:$0xff]   ;;  %v1448_v42 = vld [vmem:[#allocation8 + $0x28] sm:$0xff]  }
  0x49   :  { %1329 = vmatpush3.bf16.msra.mxu1 %v1440_v12  ;;  %v1449_v43 = vld [vmem:[#allocation8 + $0x20] sm:$0xff]   ;;  %v1450_v44 = vld [vmem:[#allocation8 + $0x18] sm:$0xff]  }
  0x4a   :  { %1330 = vmatprep.subr.bf16.mxu1 %v1441_v13  ;;  %v1113_v47 = vld [vmem:[%s1853_s2] ss:$0 sm:$0xff] }
  0x4b   :  { %1299 = vmatpush3.bf16.msra.mxu0 %v1433_v3 }
  0x4c   :  { %1300 = vmatprep.subr.bf16.mxu0 %v1434_v7 }
  0x4d   :  { %1331 = vmatpush3.bf16.msra.mxu1 %v1441_v13 }
  0x4e   :  { %1332 = vmatprep.subr.bf16.mxu1 %v1442_v15 }
  0x4f   :  { %1301 = vmatpush3.bf16.msra.mxu0 %v1434_v7 }
  0x50   :  { %1302 = vmatprep.subr.bf16.mxu0 %v1435_v10 }
  0x51   :  { %1333 = vmatpush3.bf16.msra.mxu1 %v1442_v15 }
  0x52   :  { %1334 = vmatprep.subr.bf16.mxu1 %v1443_v37 }
  0x53   :  { %1303 = vmatpush3.bf16.msra.mxu0 %v1435_v10 }
  0x54   :  { %1304 = vmatprep.subr.bf16.mxu0 %v1436_v11 }
  0x55   :  { %1335 = vmatpush3.bf16.msra.mxu1 %v1443_v37 }
  0x56   :  { %1336 = vmatprep.subr.bf16.mxu1 %v1444_v38 }
  0x57   :  { %1305 = vmatpush3.bf16.msra.mxu0 %v1436_v11 }
  0x58   :  { %1306 = vmatprep.subr.bf16.mxu0 %v1437_v14 }
  0x59   :  { %1337 = vmatpush3.bf16.msra.mxu1 %v1444_v38  ;;  %v1451_v38 = vld [vmem:[#allocation8 + $0x10] sm:$0xff]  }
  0x5a   :  { %1338 = vmatprep.subr.bf16.mxu1 %v1445_v39 }
  0x5b   :  { %1307 = vmatpush3.bf16.msra.mxu0 %v1437_v14 }
  0x5c   :  { %1356 = vmatprep.subr.bf16.mxu0 %v1446_v40 }
  0x5d   :  { %1339 = vmatpush3.bf16.msra.mxu1 %v1445_v39  ;;  %v1452_v39 = vld [vmem:[#allocation8 + $0x8] sm:$0xff]  }
  0x5e   :  { %1309 = vmatmul.mubr.bf16.vlgmr.msra.gmra.mxu0 %v119_v20 }
  0x5f   :  { %1312 = vmatprep.mubr.bf16.mxu0 %v120_v21  ;;  %1357 = vmatpush3.bf16.msra.mxu0 %v1446_v40  ;;  %v1453_v40 = vld [vmem:[#allocation8] sm:$0xff]  }
  0x60   :  { %1358 = vmatprep.subr.bf16.mxu0 %v1447_v41 }
  0x63   :  { %1359 = vmatpush3.bf16.msra.mxu0 %v1447_v41  ;;  %v1454_v41 = vld [vmem:[#allocation10 + $0x38] sm:$0xff]  }
  0x64   :  { %1360 = vmatprep.subr.bf16.mxu0 %v1448_v42  ;;  %1388 = vmatprep.subr.bf16.mxu1 %v1454_v41 }
  0x66   :  { %1313 = vmatmul.mubr.bf16.gmra.mxu0 %v121_v26 }
  0x67   :  { %1316 = vmatprep.mubr.bf16.mxu0 %v122_v27  ;;  %1361 = vmatpush3.bf16.msra.mxu0 %v1448_v42  ;;  %v1455_v42 = vld [vmem:[#allocation10 + $0x30] sm:$0xff]  }
  0x68   :  { %1362 = vmatprep.subr.bf16.mxu0 %v1449_v43 }
  0x6b   :  { %1363 = vmatpush3.bf16.msra.mxu0 %v1449_v43  ;;  %v1456_v43 = vld [vmem:[#allocation10 + $0x28] sm:$0xff]  }
  0x6c   :  { %1364 = vmatprep.subr.bf16.mxu0 %v1450_v44 }
  0x6e   :  { %1317 = vmatmul.mubr.bf16.gmra.mxu0 %v123_v32 }
  0x6f   :  { %1320 = vmatprep.mubr.bf16.mxu0 %v124_v33  ;;  %1365 = vmatpush3.bf16.msra.mxu0 %v1450_v44  ;;  %v1457_v44 = vld [vmem:[#allocation10 + $0x20] sm:$0xff]  }
  0x70   :  { %1366 = vmatprep.subr.bf16.mxu0 %v1451_v38 }
  0x73   :  { %1367 = vmatpush3.bf16.msra.mxu0 %v1451_v38 }
  0x74   :  { %1368 = vmatprep.subr.bf16.mxu0 %v1452_v39 }
  0x76   :  { %1321 = vmatmul.mubr.bf16.gmra.mxu0 %v125_v36 }
  0x77   :  { %1369 = vmatpush3.bf16.msra.mxu0 %v1452_v39  ;;  %v1459_v39 = vld [vmem:[#allocation10 + $0x10] sm:$0xff]  }
  0x78   :  { %1370 = vmatprep.subr.bf16.mxu0 %v1453_v40 }
  0x7b   :  { %1371 = vmatpush3.bf16.msra.mxu0 %v1453_v40  ;;  %v1460_v40 = vld [vmem:[#allocation10 + $0x8] sm:$0xff]  }
 0x11e   :  { %v1310_v45 = vpop.f32.mrf.mxu0 }
 0x11f   :  { %v240_v51 = vadd.f32 %v1310_v45, %v1113_v47  ;;  %v1458_v45 = vld [vmem:[#allocation10 + $0x18] sm:$0xff]  }
 0x120   :  { %v231_v46 = vpop.f32.mrf.mxu0 }
 0x121   :  { %v232_v49 = vadd.f32 %v1113_v47, %v231_v46  ;;  %v296_v58 = vmax.f32 %v240_v51, 0.0 }
 0x122   :  { %v1311_v48 = vpop.f32.mrf.mxu0 }
 0x123   :  { %v243_v50 = vadd.f32 %v1311_v48, %v1113_v47  ;;  %v294_v56 = vmax.f32 %v232_v49, 0.0  ;;  %v1122_v48 = vld [vmem:[%s1855_s4] ss:$0 sm:$0xff] }
 0x124   :  { %v234_v52 = vpop.f32.mrf.mxu0 }
 0x125   :  { %v235_v53 = vadd.f32 %v1113_v47, %v234_v52  ;;  %v297_v54 = vmax.f32 %v243_v50, 0.0 }
 0x126   :  { %v1314_v55 = vpop.f32.mrf.mxu0 }
 0x127   :  { %v295_v57 = vmax.f32 %v235_v53, 0.0  ;;  %v311_v61 = vpack.c.bf16 %v297_v54, %v296_v58  ;;  %v256_v1 = vadd.f32 %v1314_v55, %v1113_v47 }
 0x128   :  { %v247_v59 = vpop.f32.mrf.mxu0 }
 0x129   :  { %v310_v60 = vpack.c.bf16 %v295_v57, %v294_v56  ;;  %v248_v63 = vadd.f32 %v1113_v47, %v247_v59  ;;  %v300_v8 = vmax.f32 %v256_v1, 0.0 }
 0x12a   :  { %v1315_v62 = vpop.f32.mrf.mxu0 }
 0x12b   :  { %v259_v0 = vadd.f32 %v1315_v62, %v1113_v47  ;;  %1340 = vmatprep.mubr.bf16.mxu1 %v310_v60  ;;  %v298_v6 = vmax.f32 %v248_v63, 0.0 }
 0x12c   :  { %v250_v2 = vpop.f32.mrf.mxu0  ;;  %1341 = vmatmul.mubr.bf16.vlgmr.msra.gmra.mxu1 %v311_v61 }
 0x12d   :  { %v251_v3 = vadd.f32 %v1113_v47, %v250_v2  ;;  %v301_v4 = vmax.f32 %v259_v0, 0.0  ;;  %1389 = vmatpush3.bf16.msra.mxu1 %v1454_v41  ;;  %v1461_v41 = vld [vmem:[#allocation10] sm:$0xff]  }
 0x12e   :  { %v1318_v5 = vpop.f32.mrf.mxu0  ;;  %1390 = vmatprep.subr.bf16.mxu1 %v1455_v42 }
 0x12f   :  { %v299_v7 = vmax.f32 %v251_v3, 0.0  ;;  %v313_v11 = vpack.c.bf16 %v301_v4, %v300_v8  ;;  %v272_v15 = vadd.f32 %v1318_v5, %v1113_v47 }
 0x130   :  { %v263_v9 = vpop.f32.mrf.mxu0 }
 0x131   :  { %v312_v10 = vpack.c.bf16 %v299_v7, %v298_v6  ;;  %v264_v13 = vadd.f32 %v1113_v47, %v263_v9  ;;  %v304_v22 = vmax.f32 %v272_v15, 0.0  ;;  %1391 = vmatpush3.bf16.msra.mxu1 %v1455_v42 }
 0x132   :  { %v1319_v12 = vpop.f32.mrf.mxu0  ;;  %1392 = vmatprep.subr.bf16.mxu1 %v1456_v43 }
 0x133   :  { %v275_v14 = vadd.f32 %v1319_v12, %v1113_v47  ;;  %1344 = vmatprep.mubr.bf16.mxu1 %v312_v10  ;;  %v302_v20 = vmax.f32 %v264_v13, 0.0 }
 0x134   :  { %v266_v16 = vpop.f32.mrf.mxu0  ;;  %1345 = vmatmul.mubr.bf16.gmra.mxu1 %v313_v11 }
 0x135   :  { %v267_v17 = vadd.f32 %v1113_v47, %v266_v16  ;;  %v305_v18 = vmax.f32 %v275_v14, 0.0  ;;  %1393 = vmatpush3.bf16.msra.mxu1 %v1456_v43 }
 0x136   :  { %v1322_v19 = vpop.f32.mrf.mxu0  ;;  %1394 = vmatprep.subr.bf16.mxu1 %v1457_v44 }
 0x137   :  { %v303_v21 = vmax.f32 %v267_v17, 0.0  ;;  %v315_v25 = vpack.c.bf16 %v305_v18, %v304_v22  ;;  %v288_v29 = vadd.f32 %v1322_v19, %v1113_v47 }
 0x138   :  { %v279_v23 = vpop.f32.mrf.mxu0 }
 0x139   :  { %v314_v24 = vpack.c.bf16 %v303_v21, %v302_v20  ;;  %v280_v27 = vadd.f32 %v1113_v47, %v279_v23  ;;  %v308_v35 = vmax.f32 %v288_v29, 0.0  ;;  %1395 = vmatpush3.bf16.msra.mxu1 %v1457_v44  ;;  %v1131_v44 = vld [vmem:[%s1857_s6] ss:$0 sm:$0xff] }
 0x13a   :  { %v1323_v26 = vpop.f32.mrf.mxu0  ;;  %1396 = vmatprep.subr.bf16.mxu1 %v1458_v45 }
 0x13b   :  { %v291_v28 = vadd.f32 %v1323_v26, %v1113_v47  ;;  %1348 = vmatprep.mubr.bf16.mxu1 %v314_v24  ;;  %v306_v33 = vmax.f32 %v280_v27, 0.0 }
 0x13c   :  { %v282_v30 = vpop.f32.mrf.mxu0  ;;  %1349 = vmatmul.mubr.bf16.gmra.mxu1 %v315_v25 }
 0x13d   :  { %v283_v31 = vadd.f32 %v1113_v47, %v282_v30  ;;  %v309_v32 = vmax.f32 %v291_v28, 0.0  ;;  %1397 = vmatpush3.bf16.msra.mxu1 %v1458_v45 }
 0x13e   :  { %1398 = vmatprep.subr.bf16.mxu1 %v1459_v39 }
 0x13f   :  { %v307_v34 = vmax.f32 %v283_v31, 0.0  ;;  %v317_v37 = vpack.c.bf16 %v309_v32, %v308_v35 }
 0x141   :  { %v316_v36 = vpack.c.bf16 %v307_v34, %v306_v33  ;;  %1399 = vmatpush3.bf16.msra.mxu1 %v1459_v39 }
 0x142   :  { %1400 = vmatprep.subr.bf16.mxu1 %v1460_v40 }
 0x143   :  { %1352 = vmatprep.mubr.bf16.mxu1 %v316_v36 }
 0x144   :  { %1353 = vmatmul.mubr.bf16.gmra.mxu1 %v317_v37 }
 0x145   :  { %1401 = vmatpush3.bf16.msra.mxu1 %v1460_v40 }
 0x146   :  { %1402 = vmatprep.subr.bf16.mxu1 %v1461_v41 }
 0x149   :  { %1403 = vmatpush3.bf16.msra.mxu1 %v1461_v41 }
 0x1ec   :  { %v1342_v46 = vpop.f32.mrf.mxu1 }
 0x1ed   :  { %v432_v52 = vadd.f32 %v1342_v46, %v1122_v48 }
 0x1ee   :  { %v423_v47 = vpop.f32.mrf.mxu1 }
 0x1ef   :  { %v424_v50 = vadd.f32 %v1122_v48, %v423_v47  ;;  %v488_v59 = vmax.f32 %v432_v52, 0.0 }
 0x1f0   :  { %v1343_v49 = vpop.f32.mrf.mxu1 }
 0x1f1   :  { %v435_v51 = vadd.f32 %v1343_v49, %v1122_v48  ;;  %v486_v57 = vmax.f32 %v424_v50, 0.0 }
 0x1f2   :  { %v426_v53 = vpop.f32.mrf.mxu1 }
 0x1f3   :  { %v427_v54 = vadd.f32 %v1122_v48, %v426_v53  ;;  %v489_v55 = vmax.f32 %v435_v51, 0.0 }
 0x1f4   :  { %v1346_v56 = vpop.f32.mrf.mxu1 }
 0x1f5   :  { %v487_v58 = vmax.f32 %v427_v54, 0.0  ;;  %v503_v62 = vpack.c.bf16 %v489_v55, %v488_v59  ;;  %v448_v2 = vadd.f32 %v1346_v56, %v1122_v48 }
 0x1f6   :  { %v439_v60 = vpop.f32.mrf.mxu1 }
 0x1f7   :  { %v502_v61 = vpack.c.bf16 %v487_v58, %v486_v57  ;;  %v440_v0 = vadd.f32 %v1122_v48, %v439_v60  ;;  %v492_v9 = vmax.f32 %v448_v2, 0.0 }
 0x1f8   :  { %v1347_v63 = vpop.f32.mrf.mxu1 }
 0x1f9   :  { %v451_v1 = vadd.f32 %v1347_v63, %v1122_v48  ;;  %1372 = vmatprep.mubr.bf16.mxu0 %v502_v61  ;;  %v490_v7 = vmax.f32 %v440_v0, 0.0 }
 0x1fa   :  { %v442_v3 = vpop.f32.mrf.mxu1  ;;  %1373 = vmatmul.mubr.bf16.vlgmr.msra.gmra.mxu0 %v503_v62 }
 0x1fb   :  { %v443_v4 = vadd.f32 %v1122_v48, %v442_v3  ;;  %v493_v5 = vmax.f32 %v451_v1, 0.0 }
 0x1fc   :  { %v1350_v6 = vpop.f32.mrf.mxu1 }
 0x1fd   :  { %v491_v8 = vmax.f32 %v443_v4, 0.0  ;;  %v505_v12 = vpack.c.bf16 %v493_v5, %v492_v9  ;;  %v464_v16 = vadd.f32 %v1350_v6, %v1122_v48 }
 0x1fe   :  { %v455_v10 = vpop.f32.mrf.mxu1 }
 0x1ff   :  { %v504_v11 = vpack.c.bf16 %v491_v8, %v490_v7  ;;  %v456_v14 = vadd.f32 %v1122_v48, %v455_v10  ;;  %v496_v23 = vmax.f32 %v464_v16, 0.0 }
 0x200   :  { %v1351_v13 = vpop.f32.mrf.mxu1 }
 0x201   :  { %v467_v15 = vadd.f32 %v1351_v13, %v1122_v48  ;;  %1376 = vmatprep.mubr.bf16.mxu0 %v504_v11  ;;  %v494_v21 = vmax.f32 %v456_v14, 0.0 }
 0x202   :  { %v458_v17 = vpop.f32.mrf.mxu1  ;;  %1377 = vmatmul.mubr.bf16.gmra.mxu0 %v505_v12 }
 0x203   :  { %v459_v18 = vadd.f32 %v1122_v48, %v458_v17  ;;  %v497_v19 = vmax.f32 %v467_v15, 0.0 }
 0x204   :  { %v1354_v20 = vpop.f32.mrf.mxu1 }
 0x205   :  { %v495_v22 = vmax.f32 %v459_v18, 0.0  ;;  %v507_v26 = vpack.c.bf16 %v497_v19, %v496_v23  ;;  %v480_v30 = vadd.f32 %v1354_v20, %v1122_v48 }
 0x206   :  { %v471_v24 = vpop.f32.mrf.mxu1 }
 0x207   :  { %v506_v25 = vpack.c.bf16 %v495_v22, %v494_v21  ;;  %v472_v28 = vadd.f32 %v1122_v48, %v471_v24  ;;  %v500_v36 = vmax.f32 %v480_v30, 0.0 }
 0x208   :  { %v1355_v27 = vpop.f32.mrf.mxu1 }
 0x209   :  { %v483_v29 = vadd.f32 %v1355_v27, %v1122_v48  ;;  %1380 = vmatprep.mubr.bf16.mxu0 %v506_v25  ;;  %v498_v34 = vmax.f32 %v472_v28, 0.0 }
 0x20a   :  { %v474_v31 = vpop.f32.mrf.mxu1  ;;  %1381 = vmatmul.mubr.bf16.gmra.mxu0 %v507_v26 }
 0x20b   :  { %v475_v32 = vadd.f32 %v1122_v48, %v474_v31  ;;  %v501_v33 = vmax.f32 %v483_v29, 0.0 }
 0x20d   :  { %v499_v35 = vmax.f32 %v475_v32, 0.0  ;;  %v509_v38 = vpack.c.bf16 %v501_v33, %v500_v36 }
 0x20f   :  { %v508_v37 = vpack.c.bf16 %v499_v35, %v498_v34  ;;  %v1140_v35 = vld [vmem:[%s1859_s8] ss:$0 sm:$0xff]  ;;  %s1663_s8 = smov [#allocation11]  }
 0x210   :  { %s1099_s19 = sshll.u32 %s1663_s8, 4  ;;  %s1100_s19 = int_to_ptr.vmem [resolvable:$true] %s1099_s19 }
 0x211   :  { %1384 = vmatprep.mubr.bf16.mxu0 %v508_v37  ;;  %s1626_s20 = scalar_lea.vmem %s1100_s19, 1024  ;;  %p1631_p12 = scmp.lt.s32.totalorder %s1100_s19, %s1100_s19 }
 0x212   :  { %1385 = vmatmul.mubr.bf16.gmra.mxu0 %v509_v38  ;;  %p1627_p11 = scmp.ne.s32.totalorder %s1100_s19, %s1626_s20  ;;  %p1632_p13 = scmp.lt.s32.totalorder %s1626_s20, %s1626_s20 }
 0x214   :  { %p1633_p0 = por %p1632_p13, %p1631_p12 }
 0x216   :  { %p1634_p1 = pnand %p1633_p0, %p1627_p11 }
 0x2ba   :  { %v1374_v42 = vpop.f32.mrf.mxu0 }
 0x2bb   :  { %v624_v48 = vadd.f32 %v1374_v42, %v1131_v44 }
 0x2bc   :  { %v615_v43 = vpop.f32.mrf.mxu0 }
 0x2bd   :  { %v616_v46 = vadd.f32 %v1131_v44, %v615_v43  ;;  %v680_v55 = vmax.f32 %v624_v48, 0.0 }
 0x2be   :  { %v1375_v45 = vpop.f32.mrf.mxu0 }
 0x2bf   :  { %v627_v47 = vadd.f32 %v1375_v45, %v1131_v44  ;;  %v678_v53 = vmax.f32 %v616_v46, 0.0 }
 0x2c0   :  { %v618_v49 = vpop.f32.mrf.mxu0 }
 0x2c1   :  { %v619_v50 = vadd.f32 %v1131_v44, %v618_v49  ;;  %v681_v51 = vmax.f32 %v627_v47, 0.0 }
 0x2c2   :  { %v1378_v52 = vpop.f32.mrf.mxu0 }
 0x2c3   :  { %v679_v54 = vmax.f32 %v619_v50, 0.0  ;;  %v695_v58 = vpack.c.bf16 %v681_v51, %v680_v55  ;;  %v640_v62 = vadd.f32 %v1378_v52, %v1131_v44 }
 0x2c4   :  { %v631_v56 = vpop.f32.mrf.mxu0 }
 0x2c5   :  { %v694_v57 = vpack.c.bf16 %v679_v54, %v678_v53  ;;  %v632_v60 = vadd.f32 %v1131_v44, %v631_v56  ;;  %v684_v5 = vmax.f32 %v640_v62, 0.0 }
 0x2c6   :  { %v1379_v59 = vpop.f32.mrf.mxu0 }
 0x2c7   :  { %v643_v61 = vadd.f32 %v1379_v59, %v1131_v44  ;;  %1404 = vmatprep.mubr.bf16.mxu1 %v694_v57  ;;  %v682_v3 = vmax.f32 %v632_v60, 0.0 }
 0x2c8   :  { %v634_v63 = vpop.f32.mrf.mxu0  ;;  %1405 = vmatmul.mubr.bf16.vlgmr.msra.gmra.mxu1 %v695_v58 }
 0x2c9   :  { %v635_v0 = vadd.f32 %v1131_v44, %v634_v63  ;;  %v685_v1 = vmax.f32 %v643_v61, 0.0 }
 0x2ca   :  { %v1382_v2 = vpop.f32.mrf.mxu0 }
 0x2cb   :  { %v683_v4 = vmax.f32 %v635_v0, 0.0  ;;  %v697_v8 = vpack.c.bf16 %v685_v1, %v684_v5  ;;  %v656_v12 = vadd.f32 %v1382_v2, %v1131_v44 }
 0x2cc   :  { %v647_v6 = vpop.f32.mrf.mxu0 }
 0x2cd   :  { %v696_v7 = vpack.c.bf16 %v683_v4, %v682_v3  ;;  %v648_v10 = vadd.f32 %v1131_v44, %v647_v6  ;;  %v688_v19 = vmax.f32 %v656_v12, 0.0 }
 0x2ce   :  { %v1383_v9 = vpop.f32.mrf.mxu0 }
 0x2cf   :  { %v659_v11 = vadd.f32 %v1383_v9, %v1131_v44  ;;  %1408 = vmatprep.mubr.bf16.mxu1 %v696_v7  ;;  %v686_v17 = vmax.f32 %v648_v10, 0.0 }
 0x2d0   :  { %v650_v13 = vpop.f32.mrf.mxu0  ;;  %1409 = vmatmul.mubr.bf16.gmra.mxu1 %v697_v8 }
 0x2d1   :  { %v651_v14 = vadd.f32 %v1131_v44, %v650_v13  ;;  %v689_v15 = vmax.f32 %v659_v11, 0.0 }
 0x2d2   :  { %v1386_v16 = vpop.f32.mrf.mxu0 }
 0x2d3   :  { %v687_v18 = vmax.f32 %v651_v14, 0.0  ;;  %v699_v22 = vpack.c.bf16 %v689_v15, %v688_v19  ;;  %v672_v26 = vadd.f32 %v1386_v16, %v1131_v44 }
 0x2d4   :  { %v663_v20 = vpop.f32.mrf.mxu0 }
 0x2d5   :  { %v698_v21 = vpack.c.bf16 %v687_v18, %v686_v17  ;;  %v664_v24 = vadd.f32 %v1131_v44, %v663_v20  ;;  %v692_v32 = vmax.f32 %v672_v26, 0.0 }
 0x2d6   :  { %v1387_v23 = vpop.f32.mrf.mxu0 }
 0x2d7   :  { %v675_v25 = vadd.f32 %v1387_v23, %v1131_v44  ;;  %1412 = vmatprep.mubr.bf16.mxu1 %v698_v21  ;;  %v690_v30 = vmax.f32 %v664_v24, 0.0 }
 0x2d8   :  { %v666_v27 = vpop.f32.mrf.mxu0  ;;  %1413 = vmatmul.mubr.bf16.gmra.mxu1 %v699_v22 }
 0x2d9   :  { %v667_v28 = vadd.f32 %v1131_v44, %v666_v27  ;;  %v693_v29 = vmax.f32 %v675_v25, 0.0 }
 0x2db   :  { %v691_v31 = vmax.f32 %v667_v28, 0.0  ;;  %v701_v34 = vpack.c.bf16 %v693_v29, %v692_v32 }
 0x2dd   :  { %v700_v33 = vpack.c.bf16 %v691_v31, %v690_v30 }
 0x2df   :  { %1416 = vmatprep.mubr.bf16.mxu1 %v700_v33 }
 0x2e0   :  { %1417 = vmatmul.mubr.bf16.gmra.mxu1 %v701_v34 }
 0x388   :  { %v1406_v36 = vpop.f32.mrf.mxu1 }
 0x389   :  { %v816_v37 = vadd.f32 %v1406_v36, %v1140_v35 }
 0x38a   :  { %v807_v38 = vpop.f32.mrf.mxu1 }
 0x38b   :  { %v808_v39 = vadd.f32 %v1140_v35, %v807_v38  ;;  %874 = vmax.xlane.f32.xlu1 %v816_v37 }
 0x38c   :  { %v1407_v40 = vpop.f32.mrf.mxu1 }
 0x38d   :  { %v819_v41 = vadd.f32 %v1407_v40, %v1140_v35  ;;  %870 = vmax.xlane.f32.xlu0 %v808_v39 }
 0x38e   :  { %v810_v42 = vpop.f32.mrf.mxu1 }
 0x38f   :  { %v811_v43 = vadd.f32 %v1140_v35, %v810_v42  ;;  %876 = vmax.xlane.f32.xlu1 %v819_v41 }
 0x390   :  { %v1410_v44 = vpop.f32.mrf.mxu1 }
 0x391   :  { %872 = vmax.xlane.f32.xlu0 %v811_v43  ;;  %v832_v46 = vadd.f32 %v1410_v44, %v1140_v35 }
 0x392   :  { %v823_v45 = vpop.f32.mrf.mxu1 }
 0x393   :  { %v824_v50 = vadd.f32 %v1140_v35, %v823_v45 }
 0x394   :  { %v1411_v47 = vpop.f32.mrf.mxu1 }
 0x395   :  { %v835_v48 = vadd.f32 %v1411_v47, %v1140_v35  ;;  %882 = vmax.xlane.f32.xlu0 %v832_v46 }
 0x396   :  { %v826_v49 = vpop.f32.mrf.mxu1 }
 0x397   :  { %884 = vmax.xlane.f32.xlu1 %v835_v48  ;;  %v827_v52 = vadd.f32 %v1140_v35, %v826_v49 }
 0x398   :  { %v1414_v51 = vpop.f32.mrf.mxu1 }
 0x399   :  { %878 = vmax.xlane.f32.xlu0 %v824_v50  ;;  %v848_v54 = vadd.f32 %v1414_v51, %v1140_v35 }
 0x39a   :  { %v839_v53 = vpop.f32.mrf.mxu1 }
 0x39b   :  { %880 = vmax.xlane.f32.xlu1 %v827_v52  ;;  %v1755_v58 = vadd.f32 %v1140_v35, %v839_v53 }
 0x39c   :  { %v1415_v55 = vpop.f32.mrf.mxu1 }
 0x39d   :  { %v1753_v56 = vadd.f32 %v1415_v55, %v1140_v35  ;;  %890 = vmax.xlane.f32.xlu0 %v848_v54 }
 0x39e   :  { %v842_v57 = vpop.f32.mrf.mxu1 }
 0x39f   :  { %892 = vmax.xlane.f32.xlu1 %v1753_v56  ;;  %v1758_v60 = vadd.f32 %v1140_v35, %v842_v57 }
 0x3a0   :  { %v1418_v59 = vpop.f32.mrf.mxu1 }
 0x3a1   :  { %886 = vmax.xlane.f32.xlu0 %v1755_v58  ;;  %v1765_v1 = vadd.f32 %v1418_v59, %v1140_v35 }
 0x3a2   :  { %v855_v61 = vpop.f32.mrf.mxu1 }
 0x3a3   :  { %v1761_v62 = vadd.f32 %v1140_v35, %v855_v61  ;;  %888 = vmax.xlane.f32.xlu1 %v1758_v60 }
 0x3a4   :  { %v1419_v63 = vpop.f32.mrf.mxu1 }
 0x3a5   :  { %894 = vmax.xlane.f32.xlu0 %v1761_v62  ;;  %v1771_v3 = vadd.f32 %v1419_v63, %v1140_v35 }
 0x3a6   :  { %v858_v0 = vpop.f32.mrf.mxu1 }
 0x3a7   :  { %v1767_v2 = vadd.f32 %v1140_v35, %v858_v0 }
 0x3a9   :  { %896 = vmax.xlane.f32.xlu1 %v1767_v2  ;;  %898 = vmax.xlane.f32.xlu0 %v1765_v1 }
 0x3ad   :  { %900 = vmax.xlane.f32.xlu1 %v1771_v3 }
 0x414   :  { %v875_v4 = vpop.xlane.xlu1 %874 }
 0x415   :  { %v904_v5 = vsub.f32 %v816_v37, %v875_v4 }
 0x416   :  { %v871_v6 = vpop.xlane.xlu0 %870 }
 0x417   :  { %v922_v7 = vmul.f32 1.442695, %v904_v5  ;;  %v902_v8 = vsub.f32 %v808_v39, %v871_v6 }
 0x418   :  { %v877_v9 = vpop.xlane.xlu1 %876 }
 0x419   :  { %1462 = vpow2.f32 %v922_v7  ;;  %v918_v10 = vmul.f32 1.442695, %v902_v8  ;;  %v905_v11 = vsub.f32 %v819_v41, %v877_v9 }
 0x41a   :  { %v873_v12 = vpop.xlane.xlu0 %872 }
 0x41b   :  { %v924_v13 = vmul.f32 1.442695, %v905_v11  ;;  %v903_v14 = vsub.f32 %v811_v43, %v873_v12  ;;  %1464 = vpow2.f32 %v918_v10 }
 0x41d   :  { %1466 = vpow2.f32 %v924_v13  ;;  %v920_v15 = vmul.f32 1.442695, %v903_v14 }
 0x41e   :  { %v883_v16 = vpop.xlane.xlu0 %882 }
 0x41f   :  { %v908_v17 = vsub.f32 %v832_v46, %v883_v16  ;;  %1468 = vpow2.f32 %v920_v15 }
 0x420   :  { %v885_v18 = vpop.xlane.xlu1 %884 }
 0x421   :  { %v930_v19 = vmul.f32 1.442695, %v908_v17  ;;  %v909_v20 = vsub.f32 %v835_v48, %v885_v18 }
 0x422   :  { %v879_v21 = vpop.xlane.xlu0 %878 }
 0x423   :  { %1470 = vpow2.f32 %v930_v19  ;;  %v932_v22 = vmul.f32 1.442695, %v909_v20  ;;  %v906_v23 = vsub.f32 %v824_v50, %v879_v21 }
 0x424   :  { %v881_v24 = vpop.xlane.xlu1 %880 }
 0x425   :  { %1472 = vpow2.f32 %v932_v22  ;;  %v926_v25 = vmul.f32 1.442695, %v906_v23  ;;  %v907_v26 = vsub.f32 %v827_v52, %v881_v24 }
 0x426   :  { %v1774_v27 = vpop.eup %1462  ;;  %v891_v28 = vpop.xlane.xlu0 %890 }
 0x427   :  { %1474 = vpow2.f32 %v926_v25  ;;  %v928_v29 = vmul.f32 1.442695, %v907_v26  ;;  %v912_v30 = vsub.f32 %v848_v54, %v891_v28  ;;  %954 = vadd.xlane.f32.xlu0 %v1774_v27 }
 0x428   :  { %v893_v31 = vpop.xlane.xlu1 %892  ;;  %v1777_v32 = vpop.eup %1464 }
 0x429   :  { %1476 = vpow2.f32 %v928_v29  ;;  %v938_v33 = vmul.f32 1.442695, %v912_v30  ;;  %v913_v34 = vsub.f32 %v1753_v56, %v893_v31 }
 0x42a   :  { %v1780_v35 = vpop.eup %1466  ;;  %v887_v36 = vpop.xlane.xlu0 %886 }
 0x42b   :  { %1478 = vpow2.f32 %v938_v33  ;;  %v940_v37 = vmul.f32 1.442695, %v913_v34  ;;  %v910_v38 = vsub.f32 %v1755_v58, %v887_v36  ;;  %956 = vadd.xlane.f32.xlu1 %v1780_v35  ;;  %950 = vadd.xlane.f32.xlu0 %v1777_v32 }
 0x42c   :  { %v889_v39 = vpop.xlane.xlu1 %888  ;;  %v1786_v42 = vpop.eup %1468 }
 0x42d   :  { %1480 = vpow2.f32 %v940_v37  ;;  %v934_v40 = vmul.f32 1.442695, %v910_v38  ;;  %v911_v41 = vsub.f32 %v1758_v60, %v889_v39 }
 0x42e   :  { %v895_v43 = vpop.xlane.xlu0 %894 }
 0x42f   :  { %1482 = vpow2.f32 %v934_v40  ;;  %v936_v44 = vmul.f32 1.442695, %v911_v41  ;;  %v914_v45 = vsub.f32 %v1761_v62, %v895_v43  ;;  %952 = vadd.xlane.f32.xlu1 %v1786_v42 }
 0x430   :  { %v1790_v46 = vpop.eup %1470 }
 0x431   :  { %1484 = vpow2.f32 %v936_v44  ;;  %v942_v47 = vmul.f32 1.442695, %v914_v45  ;;  %962 = vadd.xlane.f32.xlu0 %v1790_v46 }
 0x432   :  { %v1793_v48 = vpop.eup %1472  ;;  %v897_v49 = vpop.xlane.xlu1 %896 }
 0x433   :  { %v899_v50 = vpop.xlane.xlu0 %898  ;;  %1486 = vpow2.f32 %v942_v47  ;;  %v915_v51 = vsub.f32 %v1767_v2, %v897_v49  ;;  %964 = vadd.xlane.f32.xlu1 %v1793_v48 }
 0x434   :  { %v916_v52 = vsub.f32 %v1765_v1, %v899_v50  ;;  %v1798_v53 = vpop.eup %1474 }
 0x435   :  { %v944_v54 = vmul.f32 1.442695, %v915_v51  ;;  %958 = vadd.xlane.f32.xlu0 %v1798_v53 }
 0x436   :  { %v946_v55 = vmul.f32 1.442695, %v916_v52  ;;  %v1801_v56 = vpop.eup %1476  ;;  %v901_v57 = vpop.xlane.xlu1 %900 }
 0x437   :  { %1488 = vpow2.f32 %v944_v54  ;;  %v917_v58 = vsub.f32 %v1771_v3, %v901_v57  ;;  %960 = vadd.xlane.f32.xlu1 %v1801_v56 }
 0x438   :  { %v1805_v59 = vpop.eup %1478  ;;  %1490 = vpow2.f32 %v946_v55 }
 0x439   :  { %v948_v60 = vmul.f32 1.442695, %v917_v58  ;;  %970 = vadd.xlane.f32.xlu0 %v1805_v59 }
 0x43a   :  { %v1808_v61 = vpop.eup %1480 }
 0x43b   :  { %1492 = vpow2.f32 %v948_v60  ;;  %972 = vadd.xlane.f32.xlu1 %v1808_v61 }
 0x43c   :  { %v1811_v62 = vpop.eup %1482 }
 0x43d   :  { %966 = vadd.xlane.f32.xlu0 %v1811_v62 }
 0x43e   :  { %v1814_v63 = vpop.eup %1484 }
 0x43f   :  { %968 = vadd.xlane.f32.xlu1 %v1814_v63 }
 0x440   :  { %v1817_v0 = vpop.eup %1486 }
 0x441   :  { %974 = vadd.xlane.f32.xlu0 %v1817_v0 }
 0x444   :  { %v1820_v1 = vpop.eup %1488 }
 0x445   :  { %v1822_v2 = vpop.eup %1490  ;;  %976 = vadd.xlane.f32.xlu1 %v1820_v1 }
 0x446   :  { %978 = vadd.xlane.f32.xlu0 %v1822_v2 }
 0x448   :  { %v1826_v3 = vpop.eup %1492 }
 0x449   :  { %980 = vadd.xlane.f32.xlu1 %v1826_v3 }
 0x4b0   :  { %v955_v4 = vpop.xlane.xlu0 %954 }
 0x4b1   :  { %1494 = vrcp.f32 %v955_v4 }
 0x4b4   :  { %v957_v5 = vpop.xlane.xlu1 %956  ;;  %v951_v6 = vpop.xlane.xlu0 %950 }
 0x4b5   :  { %1496 = vrcp.f32 %v957_v5 }
 0x4b6   :  { %1498 = vrcp.f32 %v951_v6 }
 0x4b8   :  { %v953_v7 = vpop.xlane.xlu1 %952 }
 0x4b9   :  { %1500 = vrcp.f32 %v953_v7 }
 0x4ba   :  { %v963_v8 = vpop.xlane.xlu0 %962 }
 0x4bb   :  { %1502 = vrcp.f32 %v963_v8 }
 0x4bc   :  { %v965_v9 = vpop.xlane.xlu1 %964 }
 0x4bd   :  { %1504 = vrcp.f32 %v965_v9 }
 0x4be   :  { %v959_v10 = vpop.xlane.xlu0 %958  ;;  %v1495_v11 = vpop.eup %1494 }
 0x4bf   :  { %1506 = vrcp.f32 %v959_v10  ;;  %v987_v15 = vmul.f32 %v1495_v11, %v1774_v27 }
 0x4c0   :  { %v961_v12 = vpop.xlane.xlu1 %960 }
 0x4c1   :  { %1508 = vrcp.f32 %v961_v12 }
 0x4c2   :  { %v1497_v13 = vpop.eup %1496  ;;  %v971_v14 = vpop.xlane.xlu0 %970 }
 0x4c3   :  { %v989_v16 = vmul.f32 %v1497_v13, %v1780_v35  ;;  %1510 = vrcp.f32 %v971_v14  ;;  %v1499_v17 = vpop.eup %1498 }
 0x4c4   :  { %v973_v18 = vpop.xlane.xlu1 %972  ;;  %v983_v22 = vmul.f32 %v1499_v17, %v1777_v32 }
 0x4c5   :  { %v1189_v19 = vpack.c.bf16 %v989_v16, %v987_v15  ;;  %1512 = vrcp.f32 %v973_v18 }
 0x4c6   :  { %v1501_v20 = vpop.eup %1500  ;;  %v967_v21 = vpop.xlane.xlu0 %966 }
 0x4c7   :  { %1221 = vst [vmem:[#allocation11 + $0x8] sm:$0xff] %v1189_v19   ;;  %v985_v23 = vmul.f32 %v1501_v20, %v1786_v42  ;;  %1514 = vrcp.f32 %v967_v21 }
 0x4c8   :  { %v1503_v24 = vpop.eup %1502  ;;  %v969_v25 = vpop.xlane.xlu1 %968 }
 0x4c9   :  { %v1184_v26 = vpack.c.bf16 %v985_v23, %v983_v22  ;;  %1516 = vrcp.f32 %v969_v25  ;;  %v995_v29 = vmul.f32 %v1503_v24, %v1790_v46 }
 0x4ca   :  { %v1505_v27 = vpop.eup %1504  ;;  %v975_v28 = vpop.xlane.xlu0 %974 }
 0x4cb   :  { %1185 = vst [vmem:[#allocation11] sm:$0xff] %v1184_v26   ;;  %v997_v30 = vmul.f32 %v1505_v27, %v1793_v48  ;;  %1518 = vrcp.f32 %v975_v28 }
 0x4cc   :  { %v1507_v31 = vpop.eup %1506 }
 0x4cd   :  { %v1199_v33 = vpack.c.bf16 %v997_v30, %v995_v29  ;;  %v991_v32 = vmul.f32 %v1507_v31, %v1798_v53 }
 0x4ce   :  { %v1509_v34 = vpop.eup %1508  ;;  %v977_v35 = vpop.xlane.xlu1 %976 }
 0x4cf   :  { %1223 = vst [vmem:[#allocation11 + $0x18] sm:$0xff] %v1199_v33   ;;  %v993_v36 = vmul.f32 %v1509_v34, %v1801_v56  ;;  %1520 = vrcp.f32 %v977_v35  ;;  %v979_v37 = vpop.xlane.xlu0 %978 }
 0x4d0   :  { %v1511_v38 = vpop.eup %1510  ;;  %1522 = vrcp.f32 %v979_v37 }
 0x4d1   :  { %v1194_v39 = vpack.c.bf16 %v993_v36, %v991_v32  ;;  %v1003_v42 = vmul.f32 %v1511_v38, %v1805_v59 }
 0x4d2   :  { %v1513_v40 = vpop.eup %1512  ;;  %v981_v41 = vpop.xlane.xlu1 %980 }
 0x4d3   :  { %1222 = vst [vmem:[#allocation11 + $0x10] sm:$0xff] %v1194_v39   ;;  %v1005_v43 = vmul.f32 %v1513_v40, %v1808_v61  ;;  %1524 = vrcp.f32 %v981_v41 }
 0x4d4   :  { %v1515_v44 = vpop.eup %1514 }
 0x4d5   :  { %v1209_v45 = vpack.c.bf16 %v1005_v43, %v1003_v42  ;;  %v999_v47 = vmul.f32 %v1515_v44, %v1811_v62 }
 0x4d6   :  { %v1517_v46 = vpop.eup %1516 }
 0x4d7   :  { %1225 = vst [vmem:[#allocation11 + $0x28] sm:$0xff] %v1209_v45   ;;  %v1001_v48 = vmul.f32 %v1517_v46, %v1814_v63 }
 0x4d8   :  { %v1519_v50 = vpop.eup %1518 }
 0x4d9   :  { %v1204_v49 = vpack.c.bf16 %v1001_v48, %v999_v47  ;;  %v1007_v52 = vmul.f32 %v1519_v50, %v1817_v0 }
 0x4db   :  { %1224 = vst [vmem:[#allocation11 + $0x20] sm:$0xff] %v1204_v49  }
 0x4dc   :  { %v1521_v51 = vpop.eup %1520 }
 0x4dd   :  { %v1009_v53 = vmul.f32 %v1521_v51, %v1820_v1  ;;  %v1523_v54 = vpop.eup %1522 }
 0x4de   :  { %v1011_v57 = vmul.f32 %v1523_v54, %v1822_v2 }
 0x4df   :  { %v1214_v55 = vpack.c.bf16 %v1009_v53, %v1007_v52 }
 0x4e0   :  { %v1525_v56 = vpop.eup %1524 }
 0x4e1   :  { %1226 = vst [vmem:[#allocation11 + $0x30] sm:$0xff] %v1214_v55   ;;  %v1013_v58 = vmul.f32 %v1525_v56, %v1826_v3 }
 0x4e3   :  { %v1219_v59 = vpack.c.bf16 %v1013_v58, %v1011_v57 }
 0x4e5   :  { %1227 = vst [vmem:[#allocation11 + $0x38] sm:$0xff] %v1219_v59  }
 0x4e6   :  { %1637 = shalt.err (!%p1634_p1)
}
 0x4e7   :  { %1105 = dma.vmem_to_hbm [thread:$0]  %s1100_s19, 1024, %s1860_s9, [#allocation4], %s1655_s12, %s1655_s12, %s1656_s13  }
 0x4e8   :  { %1652 = dma.done.wait [#allocation4], 1024  }
 0x4e9   :  { %1653 = vsyncadd [#allocation4], 4294966272 }
 0x4ea   :  { %1109 = vsyncpa [#allocation3], 1 }
 0x4eb   :  { %1110 = vsyncpa [#allocation6], 1 }
 0x4ec   :  { %1111 = vsyncpa [#allocation9], 1 }
 0x4ed   :  { %1112 = vsyncpa [#allocation4], 1 }

</bundles_post_ra>
